<compile_context>
chip_gen: v6e
topology: v6e:2x2x1
jax: 0.10.0
libtpu: 0.0.40
codegen_flags: <defaults>
</compile_context>

<pallas_src>
import jax
import jax.numpy as jnp
from jax.experimental import pallas as pl
from jax.experimental.pallas import tpu as pltpu

H1 = 512      # fc1 out
H2 = 128      # fc2 out
OUT = 100     # logical output width (fixed by module)
OUT_PAD = 128 # lane-dense padded output width


def mlp_kernel(x_ref, w1_ref, b1_ref, w2_ref, b2_ref, w3_ref, b3_ref, o_ref):
    # fc1 + ReLU  (bf16 operands, f32 accumulation; elementwise in f32)
    x = x_ref[...].astype(jnp.bfloat16)
    h1 = jnp.dot(x, w1_ref[...], preferred_element_type=jnp.float32) + b1_ref[...]
    h1 = jnp.maximum(h1, 0.0)

    # fc2 + ReLU
    h2 = jnp.dot(h1.astype(jnp.bfloat16), w2_ref[...],
                 preferred_element_type=jnp.float32) + b2_ref[...]
    h2 = jnp.maximum(h2, 0.0)

    # out (padded to 128 cols) + sigmoid  -> lane-dense store
    z = jnp.dot(h2.astype(jnp.bfloat16), w3_ref[...],
                preferred_element_type=jnp.float32) + b3_ref[...]
    o_ref[...] = jax.nn.sigmoid(z).astype(o_ref.dtype)


def neural_network_coauthor(x, params, tile_b=256):
    """x: [B, n_dim] float32. params: dict from init_params (bf16 weights,
    f32 biases, w3/b3 zero-padded to OUT_PAD columns). Returns [B, OUT] f32."""
    B, n_dim = x.shape
    w1, b1, w2, b2, w3, b3 = (
        params["w1"], params["b1"], params["w2"],
        params["b2"], params["w3"], params["b3"],
    )

    # Tile size: multiple of 8 (sublane), capped at requested tile_b.
    tb = min(tile_b, ((B + 7) // 8) * 8)
    tb = max(8, (tb // 8) * 8)
    b_pad = ((B + tb - 1) // tb) * tb
    if b_pad != B:
        x = jnp.pad(x, ((0, b_pad - B), (0, 0)))

    grid = (b_pad // tb,)

    def const_spec(shape):
        # Whole-array block, constant index map -> DMA'd once, VMEM resident.
        return pl.BlockSpec(shape, lambda i: (0, 0))

    out = pl.pallas_call(
        mlp_kernel,
        out_shape=jax.ShapeDtypeStruct((b_pad, OUT_PAD), jnp.float32),
        grid=grid,
        in_specs=[
            pl.BlockSpec((tb, n_dim), lambda i: (i, 0)),   # x tile
            const_spec((n_dim, H1)),                       # w1
            const_spec((1, H1)),                           # b1
            const_spec((H1, H2)),                          # w2
            const_spec((1, H2)),                           # b2
            const_spec((H2, OUT_PAD)),                     # w3 (padded)
            const_spec((1, OUT_PAD)),                      # b3 (padded)
        ],
        out_specs=pl.BlockSpec((tb, OUT_PAD), lambda i: (i, 0)),
        compiler_params=pltpu.CompilerParams(
            dimension_semantics=("parallel",)),
    )(x, w1, b1, w2, b2, w3, b3)

    return out[:B, :OUT]


def init_params(key, n_dim):
    """Deterministic init matching nn.Linear shapes.

    PyTorch nn.Linear(in, out) has weight [out, in]; we store it transposed as
    [in, out]. Weights are kept in bf16 (MXU operands), biases in f32 [1, out].
    The final layer is zero-padded from OUT=100 to OUT_PAD=128 columns.
    """
    ks = jax.random.split(key, 6)

    def linear(kw, kb, fan_in, fan_out):
        bound = 1.0 / jnp.sqrt(fan_in)
        w = jax.random.uniform(kw, (fan_in, fan_out), jnp.float32, -bound, bound)
        b = jax.random.uniform(kb, (1, fan_out), jnp.float32, -bound, bound)
        return w.astype(jnp.bfloat16), b

    w1, b1 = linear(ks[0], ks[1], n_dim, H1)
    w2, b2 = linear(ks[2], ks[3], H1, H2)
    w3, b3 = linear(ks[4], ks[5], H2, OUT)
    # Pad final layer to a full 128-lane tile (extra columns sliced off later).
    w3 = jnp.pad(w3, ((0, 0), (0, OUT_PAD - OUT)))
    b3 = jnp.pad(b3, ((0, 0), (0, OUT_PAD - OUT)))
    return dict(w1=w1, b1=b1, w2=w2, b2=b2, w3=w3, b3=b3)


def reference(x, p):
    """Pure-JAX reference using the same bf16-operand / f32-accumulate math."""
    def bdot(a, w):
        return jnp.dot(a.astype(jnp.bfloat16), w,
                       preferred_element_type=jnp.float32)
    h1 = jnp.maximum(bdot(x, p["w1"]) + p["b1"], 0.0)
    h2 = jnp.maximum(bdot(h1, p["w2"]) + p["b2"], 0.0)
    z = bdot(h2, p["w3"]) + p["b3"]
    return jax.nn.sigmoid(z)[:, :OUT]


if __name__ == "__main__":
    key = jax.random.PRNGKey(0)
    k_x, k_p = jax.random.split(key)

    B, n_dim = 8, 32
    x = jax.random.normal(k_x, (B, n_dim), jnp.float32)
    params = init_params(k_p, n_dim)

    out = neural_network_coauthor(x, params)
    out = jax.block_until_ready(out)

    ref = reference(x, params)
    assert out.shape == (B, OUT)
    assert jnp.allclose(out, ref, atol=1e-4, rtol=1e-4), "mismatch vs JAX reference"

    print("KERNEL_OK")
</pallas_src>

<mosaic_0001>
module attributes {stable_mosaic.version = 11 : i64} {
  func.func @mlp_kernel(%arg0: i32, %arg1: memref<8x32xf32, #tpu.memory_space<vmem>>, %arg2: memref<32x512xbf16, #tpu.memory_space<vmem>>, %arg3: memref<1x512xf32, #tpu.memory_space<vmem>>, %arg4: memref<512x128xbf16, #tpu.memory_space<vmem>>, %arg5: memref<1x128xf32, #tpu.memory_space<vmem>>, %arg6: memref<128x128xbf16, #tpu.memory_space<vmem>>, %arg7: memref<1x128xf32, #tpu.memory_space<vmem>>, %arg8: memref<8x128xf32, #tpu.memory_space<vmem>>) attributes {dimension_semantics = [#tpu.dimension_semantics<parallel>], iteration_bounds = array<i64: 1>, scalar_prefetch = 0 : i64, scratch_operands = 0 : i64, tpu.core_type = #tpu.core_type<tc>, window_params = [{transform_indices = @transform_0, window_bounds = array<i64: 8, 32>}, {pipeline_mode = #tpu.pipeline_mode<synchronous>, transform_indices = @transform_1, window_bounds = array<i64: 32, 512>}, {pipeline_mode = #tpu.pipeline_mode<synchronous>, transform_indices = @transform_2, window_bounds = array<i64: 1, 512>}, {pipeline_mode = #tpu.pipeline_mode<synchronous>, transform_indices = @transform_3, window_bounds = array<i64: 512, 128>}, {pipeline_mode = #tpu.pipeline_mode<synchronous>, transform_indices = @transform_4, window_bounds = array<i64: 1, 128>}, {pipeline_mode = #tpu.pipeline_mode<synchronous>, transform_indices = @transform_5, window_bounds = array<i64: 128, 128>}, {pipeline_mode = #tpu.pipeline_mode<synchronous>, transform_indices = @transform_6, window_bounds = array<i64: 1, 128>}, {transform_indices = @transform_7, window_bounds = array<i64: 8, 128>}]} {
    %c0 = arith.constant 0 : index
    %c0_0 = arith.constant 0 : index
    %0 = vector.load %arg1[%c0, %c0_0] : memref<8x32xf32, #tpu.memory_space<vmem>>, vector<8x32xf32>
    %1 = arith.truncf %0 : vector<8x32xf32> to vector<8x32xbf16>
    %c0_1 = arith.constant 0 : index
    %c0_2 = arith.constant 0 : index
    %2 = vector.load %arg2[%c0_1, %c0_2] : memref<32x512xbf16, #tpu.memory_space<vmem>>, vector<32x512xbf16>
    %cst = arith.constant dense<0.000000e+00> : vector<8x512xf32>
    %3 = tpu.matmul %1, %2, %cst {dimension_numbers = #tpu.dot_dimension_numbers<[1], [0], [0], [1], [0, 0, 1, 1], [], []>} : vector<8x32xbf16>, vector<32x512xbf16>, vector<8x512xf32> -> vector<8x512xf32>
    %c0_3 = arith.constant 0 : index
    %c0_4 = arith.constant 0 : index
    %4 = vector.load %arg3[%c0_3, %c0_4] : memref<1x512xf32, #tpu.memory_space<vmem>>, vector<1x512xf32>
    %5 = vector.broadcast %4 : vector<1x512xf32> to vector<8x512xf32>
    %6 = arith.addf %3, %5 : vector<8x512xf32>
    %cst_5 = arith.constant 0.000000e+00 : f32
    %7 = vector.broadcast %cst_5 : f32 to vector<8x512xf32>
    %8 = arith.maximumf %6, %7 : vector<8x512xf32>
    %9 = arith.truncf %8 : vector<8x512xf32> to vector<8x512xbf16>
    %c0_6 = arith.constant 0 : index
    %c0_7 = arith.constant 0 : index
    %10 = vector.load %arg4[%c0_6, %c0_7] : memref<512x128xbf16, #tpu.memory_space<vmem>>, vector<512x128xbf16>
    %cst_8 = arith.constant dense<0.000000e+00> : vector<8x128xf32>
    %11 = tpu.matmul %9, %10, %cst_8 {dimension_numbers = #tpu.dot_dimension_numbers<[1], [0], [0], [1], [0, 0, 1, 1], [], []>} : vector<8x512xbf16>, vector<512x128xbf16>, vector<8x128xf32> -> vector<8x128xf32>
    %c0_9 = arith.constant 0 : index
    %c0_10 = arith.constant 0 : index
    %12 = vector.load %arg5[%c0_9, %c0_10] : memref<1x128xf32, #tpu.memory_space<vmem>>, vector<1x128xf32>
    %13 = vector.broadcast %12 : vector<1x128xf32> to vector<8x128xf32>
    %14 = arith.addf %11, %13 : vector<8x128xf32>
    %cst_11 = arith.constant 0.000000e+00 : f32
    %15 = vector.broadcast %cst_11 : f32 to vector<8x128xf32>
    %16 = arith.maximumf %14, %15 : vector<8x128xf32>
    %17 = arith.truncf %16 : vector<8x128xf32> to vector<8x128xbf16>
    %c0_12 = arith.constant 0 : index
    %c0_13 = arith.constant 0 : index
    %18 = vector.load %arg6[%c0_12, %c0_13] : memref<128x128xbf16, #tpu.memory_space<vmem>>, vector<128x128xbf16>
    %cst_14 = arith.constant dense<0.000000e+00> : vector<8x128xf32>
    %19 = tpu.matmul %17, %18, %cst_14 {dimension_numbers = #tpu.dot_dimension_numbers<[1], [0], [0], [1], [0, 0, 1, 1], [], []>} : vector<8x128xbf16>, vector<128x128xbf16>, vector<8x128xf32> -> vector<8x128xf32>
    %c0_15 = arith.constant 0 : index
    %c0_16 = arith.constant 0 : index
    %20 = vector.load %arg7[%c0_15, %c0_16] : memref<1x128xf32, #tpu.memory_space<vmem>>, vector<1x128xf32>
    %21 = vector.broadcast %20 : vector<1x128xf32> to vector<8x128xf32>
    %22 = arith.addf %19, %21 : vector<8x128xf32>
    %23 = arith.negf %22 : vector<8x128xf32>
    %24 = math.exp %23 : vector<8x128xf32>
    %cst_17 = arith.constant 1.000000e+00 : f32
    %25 = vector.broadcast %cst_17 : f32 to vector<8x128xf32>
    %26 = arith.addf %25, %24 : vector<8x128xf32>
    %27 = arith.divf %25, %26 : vector<8x128xf32>
    %c0_18 = arith.constant 0 : index
    %c0_19 = arith.constant 0 : index
    %28 = vector.load %arg8[%c0_18, %c0_19] : memref<8x128xf32, #tpu.memory_space<vmem>>, vector<8x128xf32>
    tpu.vector_store %arg8[%c0_18, %c0_19], %27 {strides = array<i32>} : memref<8x128xf32, #tpu.memory_space<vmem>>, vector<8x128xf32>,
    return
  }
  func.func @transform_0(%arg0: i32) -> (i32, i32) {
    %c0_i32 = arith.constant 0 : i32
    %c0_i32_0 = arith.constant 0 : i32
    return %arg0, %c0_i32 : i32, i32
  }
  func.func @transform_1(%arg0: i32) -> (i32, i32) {
    %c0_i32 = arith.constant 0 : i32
    %c0_i32_0 = arith.constant 0 : i32
    %c0_i32_1 = arith.constant 0 : i32
    return %c0_i32, %c0_i32_0 : i32, i32
  }
  func.func @transform_2(%arg0: i32) -> (i32, i32) {
    %c0_i32 = arith.constant 0 : i32
    %c0_i32_0 = arith.constant 0 : i32
    %c0_i32_1 = arith.constant 0 : i32
    return %c0_i32, %c0_i32_0 : i32, i32
  }
  func.func @transform_3(%arg0: i32) -> (i32, i32) {
    %c0_i32 = arith.constant 0 : i32
    %c0_i32_0 = arith.constant 0 : i32
    %c0_i32_1 = arith.constant 0 : i32
    return %c0_i32, %c0_i32_0 : i32, i32
  }
  func.func @transform_4(%arg0: i32) -> (i32, i32) {
    %c0_i32 = arith.constant 0 : i32
    %c0_i32_0 = arith.constant 0 : i32
    %c0_i32_1 = arith.constant 0 : i32
    return %c0_i32, %c0_i32_0 : i32, i32
  }
  func.func @transform_5(%arg0: i32) -> (i32, i32) {
    %c0_i32 = arith.constant 0 : i32
    %c0_i32_0 = arith.constant 0 : i32
    %c0_i32_1 = arith.constant 0 : i32
    return %c0_i32, %c0_i32_0 : i32, i32
  }
  func.func @transform_6(%arg0: i32) -> (i32, i32) {
    %c0_i32 = arith.constant 0 : i32
    %c0_i32_0 = arith.constant 0 : i32
    %c0_i32_1 = arith.constant 0 : i32
    return %c0_i32, %c0_i32_0 : i32, i32
  }
  func.func @transform_7(%arg0: i32) -> (i32, i32) {
    %c0_i32 = arith.constant 0 : i32
    %c0_i32_0 = arith.constant 0 : i32
    return %arg0, %c0_i32 : i32, i32
  }
}

</mosaic_0001>

<bundles_post_ra>
// kernel: tpu_custom_call.1
= control target key start
LH: loop header
LB: loop body
LE: loop exit
PB: predicated region body
PF: predicated region fallthrough
CT: control target
= control target key end

     0   :  { %12 = vsyncpa [#allocation3], 0  ;;  %s1146_s0 = inlined_call_operand.hbm [shape: f32[8,32], index: 0, kind: input, shape index: {}]   ;;  %s1147_s1 = inlined_call_operand.hbm [shape: bf16[32,512], index: 1, kind: input, shape index: {}]   ;;  %s1148_s2 = inlined_call_operand.hbm [shape: f32[1,512], index: 2, kind: input, shape index: {}]   ;;  %s1149_s3 = inlined_call_operand.hbm [shape: bf16[512,128], index: 3, kind: input, shape index: {}]   ;;  %s1150_s4 = inlined_call_operand.vmem [shape: f32[1,128], index: 4, kind: input, shape index: {}]   ;;  %s1151_s5 = inlined_call_operand.hbm [shape: bf16[128,128], index: 5, kind: input, shape index: {}]   ;;  %s1152_s6 = inlined_call_operand.vmem [shape: f32[1,128], index: 6, kind: input, shape index: {}]   ;;  %s1153_s7 = inlined_call_operand.hbm [shape: f32[8,128], index: 7, kind: output, shape index: {}]  }
   0x1   :  { %13 = vsyncpa [#allocation6], 0 }
   0x2   :  { %14 = vsyncpa [#allocation9], 0 }
   0x3   :  { %15 = vsyncpa [#allocation4], 0  ;;  %s1061_s24 = smov [#allocation5]  }
   0x4   :  { %s31_s25 = sshll.u32 %s1061_s24, 4  ;;  %s32_s25 = int_to_ptr.vmem [resolvable:$true] %s31_s25 }
   0x5   :  { %s941_s26 = scalar_lea.vmem %s32_s25, 1024  ;;  %p946_p1 = scmp.lt.s32.totalorder %s32_s25, %s32_s25 }
   0x6   :  { %p942_p0 = scmp.ne.s32.totalorder %s32_s25, %s941_s26  ;;  %p947_p2 = scmp.lt.s32.totalorder %s941_s26, %s941_s26 }
   0x8   :  { %p948_p3 = por %p947_p2, %p946_p1 }
   0xa   :  { %p949_p4 = pnand %p948_p3, %p942_p0 }
   0xc   :  { %952 = shalt.err (!%p949_p4)
}
   0xd   :  { %s1062_s27 = smov 256   ;;  %s1063_s28 = smov 16  }
   0xe   :  { %37 = dma.hbm_to_vmem [thread:$0]  %s1147_s1, 1024, %s32_s25, [#allocation6], %s1062_s27, %s1062_s27, %s1063_s28  }
   0xf   :  { %s1064_s8 = smov [#allocation8]  }
  0x10   :  { %s53_s9 = sshll.u32 %s1064_s8, 4  ;;  %s54_s9 = int_to_ptr.vmem [resolvable:$true] %s53_s9 }
  0x11   :  { %s961_s10 = scalar_lea.vmem %s54_s9, 4096  ;;  %p966_p6 = scmp.lt.s32.totalorder %s54_s9, %s54_s9 }
  0x12   :  { %p962_p5 = scmp.ne.s32.totalorder %s54_s9, %s961_s10  ;;  %p967_p7 = scmp.lt.s32.totalorder %s961_s10, %s961_s10 }
  0x14   :  { %p968_p8 = por %p967_p7, %p966_p6 }
  0x16   :  { %p969_p9 = pnand %p968_p8, %p962_p5 }
  0x18   :  { %972 = shalt.err (!%p969_p9)
}
  0x19   :  { %s1065_s11 = smov 64   ;;  %s1066_s12 = smov 4  }
  0x1a   :  { %59 = dma.hbm_to_vmem [thread:$0]  %s1149_s3, 4096, %s54_s9, [#allocation9], %s1065_s11, %s1065_s11, %s1066_s12  }
  0x1b   :  { %s1067_s1 = smov [#allocation2]   ;;  %s1068_s16 = smov [#allocation7]  }
  0x1c   :  { %s22_s15 = sshll.u32 %s1067_s1, 4  ;;  %s44_s17 = sshll.u32 %s1068_s16, 4  ;;  %s23_s15 = int_to_ptr.vmem [resolvable:$true] %s22_s15  ;;  %s45_s17 = int_to_ptr.vmem [resolvable:$true] %s44_s17 }
  0x1d   :  { %s981_s18 = scalar_lea.vmem %s23_s15, 128  ;;  %p986_p11 = scmp.lt.s32.totalorder %s23_s15, %s23_s15 }
  0x1e   :  { %p982_p10 = scmp.ne.s32.totalorder %s23_s15, %s981_s18  ;;  %p987_p12 = scmp.lt.s32.totalorder %s981_s18, %s981_s18 }
  0x20   :  { %p988_p13 = por %p987_p12, %p986_p11 }
  0x22   :  { %p989_p0 = pnand %p988_p13, %p982_p10 }
  0x24   :  { %992 = shalt.err (!%p989_p0)
}
  0x25   :  { %25 = dma.hbm_to_vmem [thread:$0]  %s1146_s0, 128, %s23_s15, [#allocation3]  }
  0x26   :  { %s1001_s21 = scalar_lea.vmem %s45_s17, 64  ;;  %p1006_p2 = scmp.lt.s32.totalorder %s45_s17, %s45_s17 }
  0x27   :  { %p1002_p1 = scmp.ne.s32.totalorder %s45_s17, %s1001_s21  ;;  %p1007_p3 = scmp.lt.s32.totalorder %s1001_s21, %s1001_s21 }
  0x29   :  { %p1008_p4 = por %p1007_p3, %p1006_p2 }
  0x2b   :  { %p1009_p5 = pnand %p1008_p4, %p1002_p1 }
  0x2d   :  { %1012 = shalt.err (!%p1009_p5)
}
  0x2e   :  { %47 = dma.hbm_to_vmem [thread:$0]  %s1148_s2, 64, %s45_s17, [#allocation6]  }
  0x2f   :  { %s1069_s23 = smov [#allocation10]  }
  0x30   :  { %s67_s24 = sshll.u32 %s1069_s23, 4  ;;  %s68_s24 = int_to_ptr.vmem [resolvable:$true] %s67_s24 }
  0x31   :  { %s1021_s25 = scalar_lea.vmem %s68_s24, 1024  ;;  %p1026_p7 = scmp.lt.s32.totalorder %s68_s24, %s68_s24 }
  0x32   :  { %p1022_p6 = scmp.ne.s32.totalorder %s68_s24, %s1021_s25  ;;  %p1027_p8 = scmp.lt.s32.totalorder %s1021_s25, %s1021_s25 }
  0x34   :  { %p1028_p9 = por %p1027_p8, %p1026_p7 }
  0x36   :  { %p1029_p10 = pnand %p1028_p9, %p1022_p6 }
  0x38   :  { %1032 = shalt.err (!%p1029_p10)
}
  0x39   :  { %73 = dma.hbm_to_vmem [thread:$0]  %s1151_s5, 1024, %s68_s24, [#allocation9], %s1065_s11, %s1065_s11, %s1066_s12  }
  0x3a   :  { %1053 = dma.done.wait [#allocation3], 128  }
  0x3b   :  { %1054 = vsyncadd [#allocation3], 4294967168 }
  0x3c   :  { %1055 = dma.done.wait [#allocation6], 1088  }
  0x3d   :  { %1056 = vsyncadd [#allocation6], 4294966208 }
  0x3e   :  { %1057 = dma.done.wait [#allocation9], 5120  }
  0x3f   :  { %1058 = vsyncadd [#allocation9], 4294962176  ;;  %v1070_v0 = vmov 0   ;;  %v877_v1 = vld [vmem:[#allocation5 + $0x24] ss:$16 sps:$4 sm:$0xff]   ;;  %v92_v5 = vld [vmem:[#allocation2] sm:$0xff]  ;;  %v104_v44 = vlaneseq }
  0x40   :  { %200 = vmatprep.mubr.bf16.mxu1 %v1070_v0  ;;  %v879_v2 = vld [vmem:[#allocation5 + $0x20] ss:$16 sps:$4 sm:$0xff]   ;;  %180 = vmatprep.subr.bf16.mxu1 %v877_v1  ;;  %v880_v3 = vld [vmem:[#allocation5 + $0x4] ss:$16 sps:$4 sm:$0xff]   ;;  %v885_v6 = vld [vmem:[#allocation5 + $0x2c] ss:$16 sps:$4 sm:$0xff]   ;;  %v93_v8 = vpack.c.bf16 %v92_v5, %v92_v5 }
  0x41   :  { %v882_v4 = vld [vmem:[#allocation5] ss:$16 sps:$4 sm:$0xff]   ;;  %181 = vmatpush1.bf16.msra.mxu1 %v879_v2  ;;  %v883_v7 = vld [vmem:[#allocation5 + $0x28] ss:$16 sps:$4 sm:$0xff]   ;;  %v888_v9 = vld [vmem:[#allocation5 + $0xc] ss:$16 sps:$4 sm:$0xff]  }
  0x42   :  { %182 = vmatprep.subr.bf16.mxu1 %v880_v3  ;;  %v889_v10 = vld [vmem:[#allocation8 + $0x78] sm:$0xff]   ;;  %vm164_vm0 = vcmask 261120   ;;  %v891_v12 = vld [vmem:[#allocation8 + $0x70] sm:$0xff]   ;;  %v893_v14 = vld [vmem:[#allocation8 + $0x68] sm:$0xff]   ;;  %v1071_v43 = vmov 0.0   ;;  %v105_v45 = vshrl.u32 %v104_v44, 7 }
  0x43   :  { %v890_v11 = vld [vmem:[#allocation8 + $0x38] sm:$0xff]   ;;  %791 = vmatprep.subr.bf16.mxu0 %v889_v10  ;;  %v892_v13 = vld [vmem:[#allocation8 + $0x30] sm:$0xff]   ;;  %v895_v17 = vld [vmem:[#allocation8 + $0x28] sm:$0xff]   ;;  %vm1072_vm1 = vmmov 0  }
  0x44   :  { %792 = vmatpush3.bf16.msra.mxu0 %v890_v11  ;;  %v886_v15 = vld [vmem:[#allocation5 + $0x8] ss:$16 sps:$4 sm:$0xff]   ;;  %v894_v16 = vld [vmem:[#allocation8 + $0xf8] sm:$0xff]   ;;  %v902_v24 = vld [vmem:[#allocation8 + $0xe8] sm:$0xff]   ;;  %v106_v46 = vsub.s32 0, %v105_v45  ;;  %v110_v48 = vsub.s32 1, %v105_v45 }
  0x45   :  { %183 = vmatpush1.bf16.msra.mxu1 %v882_v4  ;;  %793 = vmatprep.subr.bf16.mxu0 %v891_v12  ;;  %v897_v18 = vld [vmem:[#allocation8 + $0x60] sm:$0xff]   ;;  %v896_v19 = vld [vmem:[#allocation8 + $0xb8] sm:$0xff]   ;;  %v898_v20 = vld [vmem:[#allocation8 + $0xf0] sm:$0xff]   ;;  %v114_v53 = vsub.s32 2, %v105_v45  ;;  %v118_v56 = vsub.s32 3, %v105_v45 }
  0x46   :  { %221 = vmatprep.subr.bf16.mxu1 %v885_v6  ;;  %v899_v21 = vld [vmem:[#allocation8 + $0x20] sm:$0xff]   ;;  %v901_v22 = vld [vmem:[#allocation8 + $0x58] sm:$0xff]   ;;  %v900_v23 = vld [vmem:[#allocation8 + $0xb0] sm:$0xff]  }
  0x47   :  { %v903_v25 = vld [vmem:[#allocation8 + $0x18] sm:$0xff]   ;;  %v905_v26 = vld [vmem:[#allocation8 + $0x50] sm:$0xff]   ;;  %v904_v27 = vld [vmem:[#allocation8 + $0xa8] sm:$0xff]  }
  0x48   :  { %746 = vmatmul.mubr.msk.bf16.vlgmr.msra.gmra.mxu1 %vm164_vm0, %v93_v8  ;;  %794 = vmatpush3.bf16.msra.mxu0 %v892_v13  ;;  %v906_v28 = vld [vmem:[#allocation8 + $0xe0] sm:$0xff]   ;;  %v907_v29 = vld [vmem:[#allocation8 + $0x10] sm:$0xff]   ;;  %v909_v31 = vld [vmem:[#allocation8 + $0x48] sm:$0xff]  }
  0x49   :  { %222 = vmatpush1.bf16.msra.mxu1 %v883_v7  ;;  %241 = vmatprep.mubr.bf16.mxu1 %v1070_v0  ;;  %v908_v30 = vld [vmem:[#allocation8 + $0xa0] sm:$0xff]   ;;  %v910_v32 = vld [vmem:[#allocation8 + $0xd8] sm:$0xff]   ;;  %v911_v33 = vld [vmem:[#allocation8 + $0x8] sm:$0xff]  }
  0x4a   :  { %223 = vmatprep.subr.bf16.mxu1 %v888_v9  ;;  %795 = vmatprep.subr.bf16.mxu0 %v893_v14  ;;  %v912_v34 = vld [vmem:[#allocation8 + $0x98] sm:$0xff]   ;;  %v913_v35 = vld [vmem:[#allocation8 + $0x40] sm:$0xff]   ;;  %v914_v36 = vld [vmem:[#allocation8 + $0xd0] sm:$0xff]  }
  0x4b   :  { %v915_v37 = vld [vmem:[#allocation8] sm:$0xff]   ;;  %v916_v38 = vld [vmem:[#allocation8 + $0x90] sm:$0xff]   ;;  %v917_v39 = vld [vmem:[#allocation8 + $0xc8] sm:$0xff]  }
  0x4c   :  { %796 = vmatpush3.bf16.msra.mxu0 %v895_v17  ;;  %v918_v40 = vld [vmem:[#allocation8 + $0x88] sm:$0xff]   ;;  %v919_v41 = vld [vmem:[#allocation8 + $0xc0] sm:$0xff]   ;;  %v102_v47 = vld [vmem:[#allocation7] sm:$0xf] }
  0x4d   :  { %224 = vmatpush1.bf16.msra.mxu1 %v886_v15  ;;  %797 = vmatprep.subr.bf16.mxu0 %v897_v18  ;;  %v920_v42 = vld [vmem:[#allocation8 + $0x80] sm:$0xff]   ;;  %v107_v49 = vrot.slane %v102_v47, %v106_v46  ;;  %v111_v50 = vrot.slane %v102_v47, %v110_v48  ;;  %v115_v59 = vrot.slane %v102_v47, %v114_v53  ;;  %v921_v0 = vld [vmem:[#allocation10 + $0x38] sm:$0xff]   ;;  %v922_v6 = vld [vmem:[#allocation10 + $0x30] sm:$0xff]  }
  0x4e   :  { %813 = vmatprep.subr.bf16.mxu1 %v894_v16  ;;  %v119_v63 = vrot.slane %v102_v47, %v118_v56  ;;  %v923_v12 = vld [vmem:[#allocation10 + $0x28] sm:$0xff]   ;;  %v924_v14 = vld [vmem:[#allocation10 + $0x20] sm:$0xff]   ;;  %v925_v15 = vld [vmem:[#allocation10 + $0x18] sm:$0xff]  }
  0x4f   :  { %v926_v16 = vld [vmem:[#allocation10 + $0x10] sm:$0xff]   ;;  %v927_v17 = vld [vmem:[#allocation10 + $0x8] sm:$0xff]   ;;  %v928_v18 = vld [vmem:[#allocation10] sm:$0xff]  }
  0x50   :  { %747 = vmatmul.mubr.msk.bf16.vlgmr.msra.gmra.mxu1 %vm164_vm0, %v93_v8  ;;  %798 = vmatpush3.bf16.msra.mxu0 %v899_v21 }
  0x51   :  { %814 = vmatpush3.bf16.msra.mxu1 %v896_v19  ;;  %799 = vmatprep.subr.bf16.mxu0 %v901_v22 }
  0x52   :  { %815 = vmatprep.subr.bf16.mxu1 %v898_v20 }
  0x54   :  { %800 = vmatpush3.bf16.msra.mxu0 %v903_v25 }
  0x55   :  { %816 = vmatpush3.bf16.msra.mxu1 %v900_v23  ;;  %801 = vmatprep.subr.bf16.mxu0 %v905_v26 }
  0x56   :  { %817 = vmatprep.subr.bf16.mxu1 %v902_v24  ;;  %v748_v24 = vld [vmem:[%s1150_s4] ss:$0 sm:$0xff]  ;;  %s1073_s4 = smov [#allocation11]  }
  0x57   :  { %s727_s29 = sshll.u32 %s1073_s4, 4  ;;  %s728_s29 = int_to_ptr.vmem [resolvable:$true] %s727_s29 }
  0x58   :  { %802 = vmatpush3.bf16.msra.mxu0 %v907_v29  ;;  %s1033_s30 = scalar_lea.vmem %s728_s29, 128  ;;  %p1038_p12 = scmp.lt.s32.totalorder %s728_s29, %s728_s29 }
  0x59   :  { %818 = vmatpush3.bf16.msra.mxu1 %v904_v27  ;;  %803 = vmatprep.subr.bf16.mxu0 %v909_v31  ;;  %p1034_p11 = scmp.ne.s32.totalorder %s728_s29, %s1033_s30  ;;  %p1039_p13 = scmp.lt.s32.totalorder %s1033_s30, %s1033_s30 }
  0x5a   :  { %819 = vmatprep.subr.bf16.mxu1 %v906_v28 }
  0x5b   :  { %p1040_p0 = por %p1039_p13, %p1038_p12 }
  0x5c   :  { %804 = vmatpush3.bf16.msra.mxu0 %v911_v33 }
  0x5d   :  { %820 = vmatpush3.bf16.msra.mxu1 %v908_v30  ;;  %805 = vmatprep.subr.bf16.mxu0 %v913_v35  ;;  %p1041_p1 = pnand %p1040_p0, %p1034_p11 }
  0x5e   :  { %821 = vmatprep.subr.bf16.mxu1 %v910_v32 }
  0x60   :  { %806 = vmatpush3.bf16.msra.mxu0 %v915_v37 }
  0x61   :  { %822 = vmatpush3.bf16.msra.mxu1 %v912_v34  ;;  %844 = vmatprep.subr.bf16.mxu0 %v1071_v43  ;;  %v781_v34 = vld [vmem:[%s1152_s6] ss:$0 sm:$0xff] }
  0x62   :  { %823 = vmatprep.subr.bf16.mxu1 %v914_v36 }
  0x65   :  { %824 = vmatpush3.bf16.msra.mxu1 %v916_v38 }
  0x66   :  { %825 = vmatprep.subr.bf16.mxu1 %v917_v39 }
  0x69   :  { %826 = vmatpush3.bf16.msra.mxu1 %v918_v40 }
  0x6a   :  { %827 = vmatprep.subr.bf16.mxu1 %v919_v41 }
  0x6d   :  { %828 = vmatpush3.bf16.msra.mxu1 %v920_v42 }
 0x108   :  { %v202_v51 = vpop.f32.mrf.mxu1 }
 0x109   :  { %v203_v52 = vadd.f32 %v202_v51, %v107_v49 }
 0x10a   :  { %v204_v54 = vpop.f32.mrf.mxu1 }
 0x10b   :  { %v205_v55 = vadd.f32 %v204_v54, %v111_v50  ;;  %v250_v57 = vmax.f32 %v203_v52, 0.0 }
 0x10c   :  { %v206_v58 = vpop.f32.mrf.mxu1 }
 0x10d   :  { %v251_v60 = vmax.f32 %v205_v55, 0.0  ;;  %v254_v1 = vpack.c.bf16 %v250_v57, %v250_v57 }
 0x10e   :  { %v207_v61 = vpop.f32.mrf.mxu1 }
 0x10f   :  { %v255_v62 = vpack.c.bf16 %v251_v60, %v251_v60 }
 0x110   :  { %v243_v2 = vpop.f32.mrf.mxu1 }
 0x111   :  { %v244_v3 = vadd.f32 %v243_v2, %v115_v59  ;;  %553 = vmatprep.mubr.bf16.mxu0 %v255_v62 }
 0x112   :  { %v245_v4 = vpop.f32.mrf.mxu1  ;;  %554 = vmatmul.mubr.bf16.vlgmr.msra.gmra.mxu0 %v254_v1 }
 0x113   :  { %v246_v5 = vadd.f32 %v245_v4, %v119_v63  ;;  %845 = vmatpush3.bf16.msra.mxu0 %v921_v0  ;;  %v252_v7 = vmax.f32 %v244_v3, 0.0  ;;  %860 = vmatprep.mubr.msk.bf16.mxu0 %vm1072_vm1, %v1071_v43 }
 0x114   :  { %v247_v8 = vpop.f32.mrf.mxu1  ;;  %846 = vmatprep.subr.bf16.mxu0 %v1071_v43 }
 0x115   :  { %v253_v9 = vmax.f32 %v246_v5, 0.0  ;;  %v256_v13 = vpack.c.bf16 %v252_v7, %v252_v7 }
 0x116   :  { %v248_v10 = vpop.f32.mrf.mxu1 }
 0x117   :  { %v257_v11 = vpack.c.bf16 %v253_v9, %v253_v9  ;;  %847 = vmatpush3.bf16.msra.mxu0 %v922_v6 }
 0x118   :  { %848 = vmatprep.subr.bf16.mxu0 %v1071_v43 }
 0x119   :  { %593 = vmatprep.mubr.bf16.mxu1 %v257_v11 }
 0x11a   :  { %594 = vmatmul.mubr.bf16.vlgmr.msra.gmra.mxu1 %v256_v13 }
 0x11b   :  { %849 = vmatpush3.bf16.msra.mxu0 %v923_v12 }
 0x11c   :  { %850 = vmatprep.subr.bf16.mxu0 %v1071_v43 }
 0x11f   :  { %851 = vmatpush3.bf16.msra.mxu0 %v924_v14 }
 0x120   :  { %852 = vmatprep.subr.bf16.mxu0 %v1071_v43 }
 0x123   :  { %853 = vmatpush3.bf16.msra.mxu0 %v925_v15 }
 0x124   :  { %854 = vmatprep.subr.bf16.mxu0 %v1071_v43 }
 0x127   :  { %855 = vmatpush3.bf16.msra.mxu0 %v926_v16 }
 0x128   :  { %856 = vmatprep.subr.bf16.mxu0 %v1071_v43 }
 0x12b   :  { %857 = vmatpush3.bf16.msra.mxu0 %v927_v17 }
 0x12c   :  { %858 = vmatprep.subr.bf16.mxu0 %v1071_v43 }
 0x12f   :  { %859 = vmatpush3.bf16.msra.mxu0 %v928_v18 }
 0x1d2   :  { %v807_v19 = vpop.f32.mrf.mxu0 }
 0x1d4   :  { %v808_v20 = vpop.f32.mrf.mxu0 }
 0x1d5   :  { %v809_v23 = vadd.f32 %v808_v20, %v807_v19 }
 0x1d6   :  { %v810_v21 = vpop.f32.mrf.mxu0 }
 0x1d7   :  { %v556_v27 = vadd.f32 %v809_v23, %v748_v24 }
 0x1d8   :  { %v811_v22 = vpop.f32.mrf.mxu0 }
 0x1da   :  { %v829_v25 = vpop.f32.mrf.mxu1 }
 0x1dc   :  { %v830_v26 = vpop.f32.mrf.mxu1 }
 0x1dd   :  { %v831_v28 = vadd.f32 %v830_v26, %v829_v25 }
 0x1de   :  { %v832_v29 = vpop.f32.mrf.mxu1 }
 0x1df   :  { %v596_v30 = vadd.f32 %v831_v28, %v556_v27 }
 0x1e0   :  { %v833_v31 = vpop.f32.mrf.mxu1 }
 0x1e1   :  { %v601_v32 = vmax.f32 %v596_v30, 0.0 }
 0x1e3   :  { %v602_v33 = vpack.c.bf16 %v601_v32, %v601_v32 }
 0x1e5   :  { %861 = vmatmul.mubr.bf16.vlgmr.msra.gmra.mxu0 %v602_v33 }
 0x2a5   :  { %v708_v35 = vpop.f32.mrf.mxu0 }
 0x2a6   :  { %v709_v36 = vadd.f32 %v781_v34, %v708_v35 }
 0x2a7   :  { %v862_v37 = vpop.f32.mrf.mxu0 }
 0x2a8   :  { %v790_v38 = vmul.f32 -1.442695, %v709_v36 }
 0x2a9   :  { %v711_v39 = vpop.f32.mrf.mxu0 }
 0x2aa   :  { %929 = vpow2.f32 %v790_v38 }
 0x2ab   :  { %v863_v40 = vpop.f32.mrf.mxu0 }
 0x2b7   :  { %v930_v41 = vpop.eup %929 }
 0x2b8   :  { %v717_v42 = vadd.f32 1.0, %v930_v41 }
 0x2ba   :  { %931 = vrcp.f32 %v717_v42 }
 0x2c7   :  { %v932_v43 = vpop.eup %931 }
 0x2c8   :  { %720 = vst [vmem:[#allocation11] sm:$0xff] %v932_v43 }
 0x2c9   :  { %1044 = shalt.err (!%p1041_p1)
}
 0x2ca   :  { %730 = dma.vmem_to_hbm [thread:$0]  %s728_s29, 128, %s1153_s7, [#allocation4]  }
 0x2cb   :  { %1059 = dma.done.wait [#allocation4], 128  }
 0x2cc   :  { %1060 = vsyncadd [#allocation4], 4294967168 }
 0x2cd   :  { %734 = vsyncpa [#allocation3], 1 }
 0x2ce   :  { %735 = vsyncpa [#allocation6], 1 }
 0x2cf   :  { %736 = vsyncpa [#allocation9], 1 }
 0x2d0   :  { %737 = vsyncpa [#allocation4], 1 }

</bundles_post_ra>
